<compile_context>
chip_gen: v5e
topology: v5e:2x2
jax: 0.10.0
libtpu: 0.0.40
codegen_flags: <defaults>
</compile_context>

<pallas_src>
import functools

import jax
import jax.numpy as jnp
from jax.experimental import pallas as pl
from jax.experimental.pallas import tpu as pltpu


def _l1_dist_kernel(pred_ref, label_ref, invsq_ref, out_ref, acc_ref,
                    *, n_rows, n_sents):
    # pred_ref / label_ref : (TB, TS, S) slab of the distance matrices.
    # invsq_ref / out_ref  : (1, 1, TB), TB lane-dense.
    # acc_ref              : (TB, S) f32 running row-sums (VMEM scratch).
    TB, TS, _ = pred_ref.shape
    b = pl.program_id(0)
    r = pl.program_id(1)

    @pl.when(r == 0)
    def _init():
        acc_ref[...] = jnp.zeros_like(acc_ref)

    pred = pred_ref[...].astype(jnp.float32)
    lab = label_ref[...].astype(jnp.float32)

    # masked validity: label != -1, plus iota masks only for ragged tile edges
    # (edge blocks read unspecified data beyond the array bounds).
    valid = lab != -1.0
    if n_rows % TS != 0:
        row_ids = r * TS + jax.lax.broadcasted_iota(jnp.int32, (1, TS, 1), 1)
        valid = jnp.logical_and(valid, row_ids < n_rows)
    if n_sents % TB != 0:
        sent_ids = b * TB + jax.lax.broadcasted_iota(jnp.int32, (TB, 1, 1), 0)
        valid = jnp.logical_and(valid, sent_ids < n_sents)

    # |pred - label| where valid else 0 (identical to |pred*m - label*m|, m in {0,1})
    diff = jnp.where(valid, jnp.abs(pred - lab), 0.0)

    # Hot loop: VPU-only partial reduction over the row tile; keep (TB, S) layout.
    acc_ref[...] += jnp.sum(diff, axis=1)

    @pl.when(r == pl.num_programs(1) - 1)
    def _finish():
        # Once per batch tile: cross-lane reduce, relayout TB -> lanes,
        # fused per-sentence 1/len^2 normalization.
        sums = jnp.sum(acc_ref[...], axis=-1)            # (TB,)
        out_ref[...] = sums[None, None, :] * invsq_ref[...]


def _tpu_plan():
    """(per-input block target bytes, vmem_limit_bytes) tuned per TPU generation."""
    try:
        kind = jax.devices()[0].device_kind.lower()
    except Exception:
        kind = ""
    if "v5 lite" in kind or "v5lite" in kind or "v5e" in kind:
        # ~820 GB/s HBM: modest blocks; explicit limit above 16 MiB scoped default.
        return 3 << 20, 28 << 20
    if "v6" in kind or "trillium" in kind:
        # ~1.4 TB/s HBM, 128 MiB physical VMEM: large blocks pay off.
        return 8 << 20, 64 << 20
    # v7x (64 MiB VMEM) and unknown generations: 6 MiB/input,
    # 2 inputs x 2 buffers = 24 MiB, well under a 48 MiB limit.
    return 6 << 20, 48 << 20


def _choose_tiles(B, S, itemsize, target_bytes):
    """Pick (TB sentences, TS rows) so one input block is ~target_bytes."""
    mat_bytes = S * S * itemsize
    if mat_bytes <= target_bytes:
        TS = S
        TB = max(1, min(B, target_bytes // mat_bytes))
    else:
        TB = 1
        TS = max(8, (target_bytes // (S * itemsize)) // 8 * 8)
        TS = min(TS, S)
    # Keep >= 2 batch tiles whenever B >= 2 so v7x's second TensorCore gets
    # work on the "parallel" axis (harmless on single-TC v5e/v6e).
    TB = max(1, min(TB, -(-B // 2)))
    return TB, TS


def l1_distance_loss(predictions, label_batch, length_batch):
    """Pallas equivalent of L1DistanceLoss.forward.

    Args:
        predictions:  [B, S, S] float array of predicted distances.
        label_batch:  [B, S, S] float array of true distances (-1 = ignore).
        length_batch: [B] int array of sentence lengths.

    Returns:
        (batch_loss, total_sents) as float32 scalars.
    """
    B, S, S2 = predictions.shape
    assert S == S2, "distance matrices must be square"

    itemsize = jnp.dtype(predictions.dtype).itemsize
    target_bytes, vmem_limit = _tpu_plan()
    TB, TS = _choose_tiles(B, S, itemsize, target_bytes)
    nb = pl.cdiv(B, TB)
    ns = pl.cdiv(S, TS)

    # Tiny per-sentence 1/len^2 factors (B floats) padded to the tile grid.
    lengths_f = length_batch.astype(jnp.float32)
    inv_sq = jnp.where(length_batch != 0, 1.0 / (lengths_f * lengths_f), 0.0)
    inv_sq = jnp.pad(inv_sq, (0, nb * TB - B)).reshape(nb, 1, TB)
    inv_sq = inv_sq.astype(jnp.float32)

    kernel = functools.partial(_l1_dist_kernel, n_rows=S, n_sents=B)

    # TODO(synk): if a v7x profile shows exposed DMA at batch-tile boundaries,
    # add pipeline_mode=pl.Buffered(3) on the two big in_specs.
    out = pl.pallas_call(
        kernel,
        out_shape=jax.ShapeDtypeStruct((nb, 1, TB), jnp.float32),
        grid_spec=pltpu.PrefetchScalarGridSpec(
            num_scalar_prefetch=0,
            grid=(nb, ns),
            in_specs=[
                pl.BlockSpec((TB, TS, S), lambda b, r: (b, r, 0)),
                pl.BlockSpec((TB, TS, S), lambda b, r: (b, r, 0)),
                pl.BlockSpec((1, 1, TB), lambda b, r: (b, 0, 0)),
            ],
            out_specs=pl.BlockSpec((1, 1, TB), lambda b, r: (b, 0, 0)),
            scratch_shapes=[pltpu.VMEM((TB, S), jnp.float32)],
        ),
        compiler_params=pltpu.CompilerParams(
            dimension_semantics=("parallel", "arbitrary"),
            vmem_limit_bytes=vmem_limit,
        ),
    )(predictions, label_batch, inv_sq)

    per_sent = out.reshape(-1)[:B]            # per-sentence loss / len^2
    total_sents = jnp.sum(length_batch != 0).astype(jnp.float32)
    batch_loss = jnp.where(
        total_sents > 0,
        jnp.sum(per_sent) / total_sents,
        jnp.float32(0.0),
    )
    return batch_loss, total_sents


def _reference(predictions, label_batch, length_batch):
    """Pure-JAX reference mirroring the PyTorch code (with 0-length guard)."""
    mask = (label_batch != -1).astype(jnp.float32)
    pm = predictions * mask
    lm = label_batch * mask
    total_sents = jnp.sum(length_batch != 0).astype(jnp.float32)
    sq = length_batch.astype(jnp.float32) ** 2
    lps = jnp.sum(jnp.abs(pm - lm), axis=(1, 2))
    norm = jnp.where(length_batch != 0, lps / sq, 0.0)
    batch_loss = jnp.where(total_sents > 0, jnp.sum(norm) / total_sents, 0.0)
    return batch_loss, total_sents


if __name__ == "__main__":
    key = jax.random.PRNGKey(0)
    B, S = 4, 16
    k1, k2 = jax.random.split(key)

    predictions = jax.random.normal(k1, (B, S, S), dtype=jnp.float32)

    # Label distance matrices; pad region (beyond sentence length) = -1.
    length_batch = jnp.array([16, 12, 9, 5], dtype=jnp.int32)
    idx = jnp.arange(S)
    true_dist = jnp.abs(idx[None, :, None] - idx[None, None, :]).astype(jnp.float32)
    true_dist = jnp.broadcast_to(true_dist, (B, S, S))
    valid = (idx[None, :, None] < length_batch[:, None, None]) & (
        idx[None, None, :] < length_batch[:, None, None]
    )
    noise = 0.1 * jax.random.normal(k2, (B, S, S), dtype=jnp.float32)
    label_batch = jnp.where(valid, true_dist + noise, jnp.float32(-1.0))

    batch_loss, total_sents = l1_distance_loss(
        predictions, label_batch, length_batch
    )
    jax.block_until_ready((batch_loss, total_sents))

    ref_loss, ref_sents = _reference(predictions, label_batch, length_batch)
    assert jnp.allclose(batch_loss, ref_loss, rtol=1e-5, atol=1e-5), (
        batch_loss,
        ref_loss,
    )
    assert jnp.allclose(total_sents, ref_sents), (total_sents, ref_sents)

    print("KERNEL_OK")
</pallas_src>

<mosaic_0001>
module attributes {stable_mosaic.version = 11 : i64} {
  func.func @_l1_dist_kernel(%arg0: i32, %arg1: i32, %arg2: memref<2x16x16xf32, #tpu.memory_space<vmem>>, %arg3: memref<2x16x16xf32, #tpu.memory_space<vmem>>, %arg4: memref<1x1x2xf32, #tpu.memory_space<vmem>>, %arg5: memref<1x1x2xf32, #tpu.memory_space<vmem>>, %arg6: memref<2x16xf32, #tpu.memory_space<vmem>>) attributes {dimension_semantics = [#tpu.dimension_semantics<parallel>, #tpu.dimension_semantics<arbitrary>], iteration_bounds = array<i64: 2, 1>, scalar_prefetch = 0 : i64, scratch_operands = 1 : i64, tpu.core_type = #tpu.core_type<tc>, window_params = [{transform_indices = @transform_0, window_bounds = array<i64: 2, 16, 16>}, {transform_indices = @transform_1, window_bounds = array<i64: 2, 16, 16>}, {transform_indices = @transform_2, window_bounds = array<i64: 1, 1, 2>}, {transform_indices = @transform_3, window_bounds = array<i64: 1, 1, 2>}]} {
    %c0_i32 = arith.constant 0 : i32
    %0 = arith.cmpi eq, %arg1, %c0_i32 : i32
    %1 = arith.extui %0 : i1 to i32
    %c0_i32_0 = arith.constant 0 : i32
    %2 = arith.cmpi ne, %1, %c0_i32_0 : i32
    scf.if %2 {
      %cst_14 = arith.constant 0.000000e+00 : f32
      %18 = vector.broadcast %cst_14 : f32 to vector<2x16xf32>
      %c0_15 = arith.constant 0 : index
      %c0_16 = arith.constant 0 : index
      %19 = vector.load %arg6[%c0_15, %c0_16] : memref<2x16xf32, #tpu.memory_space<vmem>>, vector<2x16xf32>
      tpu.vector_store %arg6[%c0_15, %c0_16], %18 {strides = array<i32>} : memref<2x16xf32, #tpu.memory_space<vmem>>, vector<2x16xf32>,
    } else {
    }
    %c0 = arith.constant 0 : index
    %c0_1 = arith.constant 0 : index
    %c0_2 = arith.constant 0 : index
    %3 = vector.load %arg2[%c0, %c0_1, %c0_2] : memref<2x16x16xf32, #tpu.memory_space<vmem>>, vector<2x16x16xf32>
    %c0_3 = arith.constant 0 : index
    %c0_4 = arith.constant 0 : index
    %c0_5 = arith.constant 0 : index
    %4 = vector.load %arg3[%c0_3, %c0_4, %c0_5] : memref<2x16x16xf32, #tpu.memory_space<vmem>>, vector<2x16x16xf32>
    %cst = arith.constant -1.000000e+00 : f32
    %5 = vector.broadcast %cst : f32 to vector<2x16x16xf32>
    %6 = arith.cmpf one, %4, %5 : vector<2x16x16xf32>
    %7 = arith.subf %3, %4 : vector<2x16x16xf32>
    %8 = math.absf %7 : vector<2x16x16xf32>
    %cst_6 = arith.constant 0.000000e+00 : f32
    %9 = vector.broadcast %cst_6 : f32 to vector<2x16x16xf32>
    %10 = arith.select %6, %8, %9 : vector<2x16x16xi1>, vector<2x16x16xf32>
    %c0_7 = arith.constant 0 : index
    %c0_8 = arith.constant 0 : index
    %11 = vector.load %arg6[%c0_7, %c0_8] : memref<2x16xf32, #tpu.memory_space<vmem>>, vector<2x16xf32>
    %cst_9 = arith.constant dense<0.000000e+00> : vector<2x16xf32>
    %12 = vector.multi_reduction <add>, %10, %cst_9 [1] : vector<2x16x16xf32> to vector<2x16xf32>
    %13 = arith.addf %11, %12 : vector<2x16xf32>
    %c0_10 = arith.constant 0 : index
    %c0_11 = arith.constant 0 : index
    %14 = vector.load %arg6[%c0_10, %c0_11] : memref<2x16xf32, #tpu.memory_space<vmem>>, vector<2x16xf32>
    tpu.vector_store %arg6[%c0_10, %c0_11], %13 {strides = array<i32>} : memref<2x16xf32, #tpu.memory_space<vmem>>, vector<2x16xf32>,
    %c0_i32_12 = arith.constant 0 : i32
    %15 = arith.cmpi eq, %arg1, %c0_i32_12 : i32
    %16 = arith.extui %15 : i1 to i32
    %c0_i32_13 = arith.constant 0 : i32
    %17 = arith.cmpi ne, %16, %c0_i32_13 : i32
    scf.if %17 {
      %c0_14 = arith.constant 0 : index
      %c0_15 = arith.constant 0 : index
      %18 = vector.load %arg6[%c0_14, %c0_15] : memref<2x16xf32, #tpu.memory_space<vmem>>, vector<2x16xf32>
      %cst_16 = arith.constant dense<0.000000e+00> : vector<2xf32>
      %19 = vector.multi_reduction <add>, %18, %cst_16 [1] : vector<2x16xf32> to vector<2xf32>
      %20 = vector.shape_cast %19 : vector<2xf32> to vector<1x1x2xf32>
      %c0_17 = arith.constant 0 : index
      %c0_18 = arith.constant 0 : index
      %c0_19 = arith.constant 0 : index
      %21 = vector.load %arg4[%c0_17, %c0_18, %c0_19] : memref<1x1x2xf32, #tpu.memory_space<vmem>>, vector<1x1x2xf32>
      %22 = arith.mulf %20, %21 : vector<1x1x2xf32>
      %c0_20 = arith.constant 0 : index
      %c0_21 = arith.constant 0 : index
      %c0_22 = arith.constant 0 : index
      %23 = vector.load %arg5[%c0_20, %c0_21, %c0_22] : memref<1x1x2xf32, #tpu.memory_space<vmem>>, vector<1x1x2xf32>
      tpu.vector_store %arg5[%c0_20, %c0_21, %c0_22], %22 {strides = array<i32>} : memref<1x1x2xf32, #tpu.memory_space<vmem>>, vector<1x1x2xf32>,
    } else {
    }
    return
  }
  func.func @transform_0(%arg0: i32, %arg1: i32) -> (i32, i32, i32) {
    %c0_i32 = arith.constant 0 : i32
    %c0_i32_0 = arith.constant 0 : i32
    return %arg0, %arg1, %c0_i32 : i32, i32, i32
  }
  func.func @transform_1(%arg0: i32, %arg1: i32) -> (i32, i32, i32) {
    %c0_i32 = arith.constant 0 : i32
    %c0_i32_0 = arith.constant 0 : i32
    return %arg0, %arg1, %c0_i32 : i32, i32, i32
  }
  func.func @transform_2(%arg0: i32, %arg1: i32) -> (i32, i32, i32) {
    %c0_i32 = arith.constant 0 : i32
    %c0_i32_0 = arith.constant 0 : i32
    %c0_i32_1 = arith.constant 0 : i32
    return %arg0, %c0_i32, %c0_i32_0 : i32, i32, i32
  }
  func.func @transform_3(%arg0: i32, %arg1: i32) -> (i32, i32, i32) {
    %c0_i32 = arith.constant 0 : i32
    %c0_i32_0 = arith.constant 0 : i32
    %c0_i32_1 = arith.constant 0 : i32
    return %arg0, %c0_i32, %c0_i32_0 : i32, i32, i32
  }
}

</mosaic_0001>

<bundles_post_ra>
// kernel: tpu_custom_call.1
= control target key start
LH: loop header
LB: loop body
LE: loop exit
PB: predicated region body
PF: predicated region fallthrough
CT: control target
= control target key end

     0   :  { %s980_s0 = inlined_call_operand.hbm [shape: f32[4,16,16], index: 0, kind: input, shape index: {}]   ;;  %s981_s1 = inlined_call_operand.hbm [shape: f32[4,16,16], index: 1, kind: input, shape index: {}]   ;;  %s982_s2 = inlined_call_operand.hbm [shape: f32[2,1,2], index: 2, kind: input, shape index: {}]   ;;  %s983_s3 = inlined_call_operand.hbm [shape: f32[2,1,2], index: 3, kind: output, shape index: {}]  }
   0x1   :  { %989 = sst [smem:[#allocation18_spill]] %s981_s1 }
   0x2   :  { %8 = vsyncpa [#allocation4], 0 }
   0x3   :  { %10 = vsyncpa [#allocation4 + $0x1], 0 }
   0x4   :  { %11 = vsyncpa [#allocation7], 0 }
   0x5   :  { %13 = vsyncpa [#allocation7 + $0x1], 0 }
   0x6   :  { %14 = vsyncpa [#allocation5], 0 }
   0x7   :  { %16 = vsyncpa [#allocation5 + $0x1], 0  ;;  %s811_s12 = smov 0   ;;  %s813_s13 = smov 0  }
   0x8   :  { %s815_s14 = smov 0   ;;  %s817_s15 = smov 0  }
   0x9   :  { %s819_s16 = smov 0   ;;  %s821_s17 = smov 0  }
   0xa LB: > { %990 = sst [smem:[#allocation13_spill]] %s773_s14  ;;  %s842_s18 = sadd.s32 4294967295, %s785_s17   ;;  %s785_s17 = sphi %s821_s17, %s22_s17   ;;  %s781_s16 = sphi %s819_s16, %s1010_s16   ;;  %s777_s15 = sphi %s817_s15, %s1009_s15   ;;  %s773_s14 = sphi %s815_s14, %s1005_s14   ;;  %s769_s13 = sphi %s813_s13, %s1008_s13   ;;  %s765_s12 = sphi %s811_s12, %s1007_s12  }
   0xb   : > { %991 = sst [smem:[#allocation14_spill]] %s785_s17  ;;  %s509_s19 = sadd.s32 4294967294, %s785_s17  }
   0xc   : > { %s34_s20 = sadd.s32 1, %s781_s16  ;;  %s43_s21 = sadd.s32 1, %s773_s14 }
   0xd   : > { %p36_p0 = scmp.ge.s32.totalorder %s34_s20, 2  ;;  %p50_p1 = scmp.ne.s32.totalorder %s773_s14, %s769_s13 }
   0xe   : > { %p51_p2 = scmp.eq.s32.totalorder %s785_s17, 0  ;;  %p56_p3 = scmp.ne.s32.totalorder %s769_s13, %s765_s12 }
   0xf   : > { %s1012_s20 = smov (%p36_p0, %s34_s20), 0  ;;  %p57_p5 = scmp.eq.s32.totalorder %s842_s18, 0 }
  0x10   : > { %992 = sst [smem:[#allocation15_spill]] %s1012_s20  ;;  %p854_p4 = por %p51_p2, %p50_p1 }
  0x11   : > { %s38_s23 = ssub.s32 %s781_s16, %s1012_s20  ;;  %p134_p6 = scmp.eq.s32.totalorder %s842_s18, 1 }
  0x12   : > { %p41_p7 = scmp.eq.s32.totalorder %s38_s23, 0  ;;  %p862_p8 = por %p57_p5, %p56_p3 }
  0x13   : > { %p866_p9 = por %p134_p6, %p50_p1  ;;  %p140_p10 = scmp.eq.s32.totalorder %s509_s19, 1 }
  0x14   : > { %s871_s26 = scalar_select %p41_p7, %s773_s14, %s43_s21  }
  0x15   : > { %p873_p11 = por %p140_p10, %p56_p3  ;;  %p511_p12 = scmp.ge.s32.totalorder %s785_s17, 2 }
  0x16   : > { %996 = sst [smem:[#allocation16_spill]] %s871_s26  ;;  %p551_p13 = scmp.lt.s32.totalorder %s785_s17, 2 }
  0x17   : > { %s997_s27 = scalar_select %p873_p11, 1, 0 }
  0x18   : > { %s880_s28 = sand.u32 1, %s773_s14   ;;  %s526_s30 = sshll.u32 %s781_s16, 5 }
  0x19   : > { %998 = sst [smem:[#allocation17_spill]] %s997_s27  ;;  %s512_s29 = sshll.u32 %s880_s28, 5 }
  0x1a   : > { %p886_p0 = pnand %p551_p13, %p854_p4  ;;  %s185_s5 = sand.u32 1, %s785_s17  }
  0x1b   : > { %s1000_s1 = sld [smem:[#allocation18_spill]]  ;;  %s189_s10 = scalar_lea.vmem [#allocation6], %s512_s29 }
  0x1c   : > { %s200_s11 = sshll.u32 %s189_s10, 4  ;;  %s186_s19 = scalar_lea.sflag [#allocation7], %s185_s5  ;;  %s201_s11 = int_to_ptr.vmem [resolvable:$true] %s200_s11 }
  0x1d   : > { %s787_s21 = smov 128   ;;  %s788_s22 = smov 8  }
  0x1e   : > { %p520_p1 = scmp.ge.s32.totalorder %s785_s17, 1  ;;  %p225_p2 = scmp.lt.s32.totalorder %s785_s17, 3 }
  0x1f   : > { %s161_s5 = scalar_lea.sflag [#allocation4], %s880_s28  ;;  %s216_s26 = scalar_lea.hbm %s982_s2, %s781_s16 }
  0x20   : > { %p898_p3 = pnand %p520_p1, %p225_p2  ;;  %s218_s14 = sshll.u32 %s216_s26, 4  ;;  %s219_s14 = int_to_ptr.hbm [resolvable:$true] %s218_s14 }
  0x21   : > { %s197_s8 = scalar_lea.hbm %s1000_s1, %s526_s30  ;;  %s164_s1 = scalar_lea.vmem [#allocation3], %s512_s29 }
  0x22   : > { %s198_s9 = sshll.u32 %s197_s8, 4  ;;  %s172_s8 = scalar_lea.hbm %s980_s0, %s526_s30  ;;  %s199_s9 = int_to_ptr.hbm [resolvable:$true] %s198_s9 }
  0x23   : > { %543 = dma.hbm_to_vmem [thread:$0]  (!%p886_p0), %s199_s9, 512, %s201_s11, %s186_s19, %s787_s21, %s787_s21, %s788_s22  }
  0x24   : > { %s173_s10 = sshll.u32 %s172_s8, 4  ;;  %s175_s20 = sshll.u32 %s164_s1, 4  ;;  %s174_s10 = int_to_ptr.hbm [resolvable:$true] %s173_s10  ;;  %s176_s20 = int_to_ptr.vmem [resolvable:$true] %s175_s20 }
  0x25   : > { %540 = dma.hbm_to_vmem [thread:$0]  (!%p886_p0), %s174_s10, 512, %s176_s20, %s161_s5, %s787_s21, %s787_s21, %s788_s22  }
  0x26   : > { %s213_s17 = scalar_lea.vmem [#allocation8], %s880_s28  ;;  %229 = sbr.rel (%p898_p3) target bundleno = 340 (0x154), region = 32 }
  0x27   : > { %s220_s27 = sshll.u32 %s213_s17, 4  ;;  %s918_s1 = sand.u32 (!%p898_p3), 1, %s769_s13   ;;  %s221_s27 = int_to_ptr.vmem [resolvable:$true] %s220_s27 }
  0x28   : > { %546 = dma.hbm_to_vmem [thread:$0]  (!%p886_p0), %s219_s14, 16, %s221_s27, %s186_s19  }
  0x29   : > { %s521_s20 = sshll.u32 (!%p898_p3), %s918_s1, 5  ;;  %s232_s29 = scalar_lea.sflag (!%p898_p3), [#allocation4], %s918_s1 }
  0x2a   : > { %s235_s30 = scalar_lea.vmem (!%p898_p3), [#allocation3], %s521_s20 }
  0x2b   : > { %752 = dma.done.wait (%p862_p8), %s232_s29, 512  }
  0x2c   : > { %754 = vsyncadd (%p862_p8), %s232_s29, 4294966784  ;;  %s241_s14 = sand.u32 1, %s842_s18   ;;  %s245_s26 = scalar_lea.vmem [#allocation6], %s521_s20 }
  0x2d   : > { %s242_s17 = scalar_lea.sflag [#allocation7], %s241_s14 }
  0x2e   : > { %756 = dma.done.wait (%p862_p8), %s242_s17, 528  }
  0x2f   : > { %758 = vsyncadd (%p862_p8), %s242_s17, 4294966768  ;;  %vm294_vm0 = vcmask 123904   ;;  %v789_v0 = vmov 0.0   ;;  %v296_v1 = vld [vmem:[%s235_s30] sm:$0xff]  ;;  %v297_v2 = vld [vmem:[%s235_s30 + $0x8] sm:$0xff]  ;;  %vm321_vm2 = vcmask 130048   ;;  %v358_v15 = vlaneseq  ;;  %s385_s28 = scalar_lea.hbm %s983_s3, %s777_s15 }
  0x30   : > { %295 = vst.msk [vmem:[#allocation2] sm:$0x3] %vm294_vm0, %v789_v0  ;;  %v298_v3 = vld [vmem:[%s235_s30 + $0x10] sm:$0xff]  ;;  %v299_v4 = vld [vmem:[%s235_s30 + $0x18] sm:$0xff]  ;;  %v300_v5 = vld [vmem:[%s245_s26] sm:$0xff]  ;;  %s254_s18 = scalar_lea.vmem [#allocation8], %s918_s1 }
  0x31   : > { %v301_v6 = vld [vmem:[%s245_s26 + $0x8] sm:$0xff]  ;;  %v302_v7 = vld [vmem:[%s245_s26 + $0x10] sm:$0xff]  ;;  %v303_v8 = vld [vmem:[%s245_s26 + $0x18] sm:$0xff]  ;;  %vm304_vm1 = vcmp.ne.f32.partialorder %v300_v5, -1.0  ;;  %v308_v9 = vsub.f32 %v296_v1, %v300_v5  ;;  %v359_v20 = vshrl.u32 %v358_v15, 7  ;;  %vm342_vm6 = vcmask 1041409  }
  0x32   : > { %v309_v10 = vsub.f32 %v297_v2, %v301_v6  ;;  %vm305_vm3 = vcmp.ne.f32.partialorder %v301_v6, -1.0  ;;  %vm306_vm4 = vcmp.ne.f32.partialorder %v302_v7, -1.0  ;;  %v310_v11 = vsub.f32 %v298_v3, %v302_v7  ;;  %v608_v46 = vld [vmem:[%s254_s18] ss:$0 sm:$0xff]  ;;  %s285_s4 = scalar_lea.vmem [#allocation9], %s918_s1  ;;  %s389_s21 = sshll.u32 %s385_s28, 4  ;;  %s390_s21 = int_to_ptr.hbm [resolvable:$true] %s389_s21 }
  0x33   : > { %v311_v12 = vsub.f32 %v299_v4, %v303_v8  ;;  %vm307_vm5 = vcmp.ne.f32.partialorder %v303_v8, -1.0  ;;  %v312_v13 = vand.u32 2147483647, %v308_v9  ;;  %605 = vset.pattern.permute.xlu0 %v359_v20  ;;  %v790_v47 = vmov 0   ;;  %s387_s19 = sshll.u32 %s285_s4, 4  ;;  %s377_s22 = scalar_lea.sflag [#allocation5], %s918_s1  ;;  %s388_s19 = int_to_ptr.vmem [resolvable:$true] %s387_s19 }
  0x34   : > { %v313_v14 = vand.u32 2147483647, %v309_v10  ;;  %v314_v16 = vand.u32 2147483647, %v310_v11  ;;  %606 = vset.pattern.permute.xlu1 %v790_v47  ;;  %v371_v51 = vand.u32 127, %v358_v15  ;;  %vm374_vm7 = vcmask 8192  }
  0x35   : > { %v315_v17 = vand.u32 2147483647, %v311_v12  ;;  %v316_v18 = vsel %vm304_vm1, %v312_v13, 0.0  ;;  %s713_s23 = sshra.s32 %s390_s21, 4  ;;  %s719_s8 = scalar_lea.hbm %s983_s3, 2  ;;  %s714_s23 = int_to_ptr.hbm [resolvable:$true] %s713_s23 }
  0x36   : > { %v317_v19 = vsel %vm305_vm3, %v313_v14, 0.0  ;;  %v318_v21 = vsel %vm306_vm4, %v314_v16, 0.0  ;;  %v322_v23 = vsel %vm321_vm2, %v316_v18, 0.0  ;;  %s715_s6 = scalar_lea.hbm %s714_s23, 1  ;;  %p720_p7 = scmp.lt.s32.totalorder %s714_s23, %s983_s3 }
  0x37   : > { %v319_v22 = vsel %vm307_vm5, %v315_v17, 0.0  ;;  %v323_v24 = vsel %vm321_vm2, %v317_v19, 0.0  ;;  %v331_v26 = vsel %vm321_vm2, %v318_v21, 0.0  ;;  %v320_v40 = vld [vmem:[#allocation2] sm:$0x3]  ;;  %p716_p4 = scmp.ne.s32.totalorder %s714_s23, %s715_s6  ;;  %p721_p8 = scmp.lt.s32.totalorder %s719_s8, %s715_s6 }
  0x38   : > { %v324_v25 = vadd.f32 %v323_v24, %v322_v23  ;;  %v332_v27 = vsel %vm321_vm2, %v319_v22, 0.0 }
  0x39   : > { %v333_v28 = vadd.f32 %v332_v27, %v331_v26  ;;  %p717_p5 = pnand %p716_p4, %p866_p9  ;;  %p722_p10 = por %p721_p8, %p720_p7 }
  0x3a   : > { %v325_v29 = vrot.slane %v324_v25, 4 }
  0x3b   : > { %v334_v30 = vrot.slane %v333_v28, 4  ;;  %p718_p6 = pneg %p717_p5 }
  0x3c   : > { %v326_v31 = vadd.f32 %v325_v29, %v324_v25 }
  0x3d   : > { %v335_v32 = vadd.f32 %v334_v30, %v333_v28  ;;  %p723_p13 = pnand %p722_p10, %p718_p6 }
  0x3e   : > { %v327_v33 = vrot.slane %v326_v31, 2 }
  0x3f   : > { %v336_v34 = vrot.slane %v335_v32, 2 }
  0x40   : > { %v328_v35 = vadd.f32 %v327_v33, %v326_v31 }
  0x41   : > { %v337_v36 = vadd.f32 %v336_v34, %v335_v32 }
  0x42   : > { %v329_v37 = vrot.slane %v328_v35, 1 }
  0x43   : > { %v338_v38 = vrot.slane %v337_v36, 1 }
  0x44   : > { %v330_v39 = vadd.f32 %v329_v37, %v328_v35 }
  0x45   : > { %v339_v41 = vadd.f32 %v338_v38, %v337_v36 }
  0x47   : > { %v343_v42 = vsel %vm342_vm6, %v339_v41, %v330_v39 }
  0x48   : > { %v345_v43 = vadd.f32 %v343_v42, %v320_v40 }
  0x4a   : > { %347 = vst.msk [vmem:[#allocation2] sm:$0x3] %vm294_vm0, %v345_v43 }
  0x51   : > { %v351_v44 = vld [vmem:[#allocation2] sm:$0x3] }
  0x52   : > { %v352_v45 = vsel %vm294_vm0, %v351_v44, 0.0 }
  0x53   : > { %353 = vadd.xlane.f32.xlu0 %v352_v45 }
  0x67   : > { %362 = vperm.xlu0 %605, %v608_v46  }
  0x6f   : > { %607 = vset.pattern.permute.xlu0 %v790_v47 }
  0xc6   : > { %v354_v48 = vpop.xlane.xlu0 %353 }
  0xd9   : > { %v363_v49 = vpop.permute.xlu0 %362 }
  0xda   : > { %v365_v50 = vmul.f32 %v363_v49, %v354_v48 }
  0xdc   : > { %368 = vperm.xlu1 %606, %v365_v50  }
 0x14e   : > { %v369_v52 = vpop.permute.xlu1 %368 }
 0x14f   : > { %v372_v53 = vperm.slane %v369_v52, %v371_v51 }
 0x151   : > { %375 = vst.msk [vmem:[%s285_s4] sm:$0x1] %vm374_vm7, %v372_v53 }
 0x152   : > { %726 = shalt.err (!%p723_p13)
}
 0x153   : > { %535 = dma.vmem_to_hbm [thread:$0]  (%p866_p9), %s388_s19, 16, %s390_s21, %s377_s22  }
 0x154 PF: > { %s1003_s11 = sld [smem:[#allocation14_spill]]  ;;  %s401_s1 = sand.u32 1, %s765_s12  }
 0x155   : > { %p548_p0 = pnand %p511_p12, %p873_p11  ;;  %s402_s20 = scalar_lea.sflag [#allocation5], %s401_s1 }
 0x157   : > { %p549_p1 = pneg %p548_p0 }
 0x159   : > { %760 = dma.done.wait (%p549_p1), %s402_s20, 16  }
 0x15a   : > { %762 = vsyncadd (%p549_p1), %s402_s20, 4294967280  ;;  %s22_s17 = sadd.s32 1, %s1003_s11   ;;  %s1004_s29 = sld [smem:[#allocation13_spill]] }
 0x15b   : > { %p19_p2 = scmp.ge.s32.totalorder %s22_s17, 4   ;;  %s1005_s14 = sld [smem:[#allocation16_spill]] }
 0x15c   : > { %s1006_s25 = sld [smem:[#allocation15_spill]]  ;;  %s1007_s12 = smov %s769_s13 }
 0x15d   : > { %s1009_s15 = smov %s781_s16 }
 0x15e   :  { %21 = sbr.rel (!%p19_p2) target bundleno = 10 (0xa), region = 109 }
 0x160   : > { %s1008_s13 = smov %s1004_s29 }
 0x162   : > { %s1010_s16 = smov %s1006_s25 }
 0x163   :  { %407 = vsyncpa [#allocation4], 1 }
 0x164   :  { %409 = vsyncpa [#allocation4 + $0x1], 1 }
 0x165   :  { %410 = vsyncpa [#allocation7], 1 }
 0x166   :  { %412 = vsyncpa [#allocation7 + $0x1], 1 }
 0x167   :  { %413 = vsyncpa [#allocation5], 1 }
 0x168   :  { %415 = vsyncpa [#allocation5 + $0x1], 1 }

</bundles_post_ra>
